<compile_context>
chip_gen: v7x
topology: tpu7x:2x2x1
jax: 0.10.0
libtpu: 0.0.40
codegen_flags: <defaults>
</compile_context>

<pallas_src>
import functools

import jax
import jax.numpy as jnp
from jax import lax
from jax.experimental import pallas as pl
from jax.experimental.pallas import tpu as pltpu


def _rmsnorm_kernel(x_ref, alpha_ref, o_ref, *, eps: float, use_var: bool, d: int):
    # x_ref: (tile_rows, D) in input dtype; alpha_ref: (1, D) f32.
    xf = x_ref[...].astype(jnp.float32)               # f32 stats

    if use_var:
        # torch.var default is unbiased (ddof=1). Two-pass centered variance:
        # numerically safe (non-negative by construction, no E[x^2]-E[x]^2
        # cancellation) and free — the tile is already in VMEM.
        mean = jnp.sum(xf, axis=-1, keepdims=True) * (1.0 / d)      # (rows, 1)
        cen = xf - mean
        # NOTE: torch.var(ddof=1) returns NaN/inf for D == 1; we guard the
        # divisor instead (intentional, documented divergence).
        denom = (d - 1) if d > 1 else 1
        var = jnp.sum(cen * cen, axis=-1, keepdims=True) * (1.0 / denom)
    else:
        var = jnp.sum(xf * xf, axis=-1, keepdims=True) * (1.0 / d)  # (rows, 1)

    inv = lax.rsqrt(eps + var)                         # (rows, 1), EUP slot
    # Re-read/cast x for the store so the stats temporary need not stay live;
    # extra VMEM vector loads are free (HBM-bound kernel, 3 vld slots/cycle).
    o_ref[...] = ((x_ref[...].astype(jnp.float32) * inv) * alpha_ref[...]).astype(
        o_ref.dtype)


def _vmem_budget_bytes() -> tuple[int, int]:
    """(tile byte budget, vmem_limit_bytes), gen-gated on physical VMEM."""
    vmem = None
    try:
        info = pltpu.get_tpu_info()
        vmem = getattr(info, "vmem_capacity_bytes", None)
    except Exception:
        vmem = None
    if vmem is not None and vmem >= (96 << 20):
        # v5e / v6e: 128 MiB VMEM per core — go big, fewer/fatter grid steps.
        return 64 << 20, 96 << 20
    # v7x (64 MiB VMEM) or unknown: stay conservative, leave headroom for
    # Mosaic internal scratch + double-buffered alpha/output.
    return 32 << 20, 48 << 20


def _pick_tile_rows(n_rows: int, d: int, dtype_bytes: int, budget_bytes: int) -> int:
    """Largest row tile whose double-buffered in/out tiles + f32 temps fit budget.

    Per row: 2 (double buffer) x (in + out) x dtype_bytes x D, plus roughly two
    f32-sized full-tile intermediates inside the kernel body. No fixed row cap:
    the byte budget is the only governor, so small-D / large-N shapes get past
    the ~1 MiB-per-step pipeline-overhead knee.
    """
    per_row = d * (4 * dtype_bytes + 8)
    t = budget_bytes // max(per_row, 1)
    t = int(min(t, max(n_rows, 8)))
    t = max(8, (t // 8) * 8)                           # sublane multiple
    return t


def rms_norm(x, alpha, *, eps: float = 1e-5, use_var: bool = True,
             tile_rows: int | None = None):
    """Pallas RMSNorm matching kyuteye's _rms_norm (dtype=None path).

    x: (B, S, D), alpha: (1, 1, D). Returns (B, S, D) in x.dtype.
    """
    B, S, D = x.shape
    N = B * S
    x2 = x.reshape(N, D)
    alpha2 = alpha.reshape(1, D).astype(jnp.float32)   # gain stays f32

    dtype_bytes = jnp.dtype(x.dtype).itemsize
    budget_bytes, vmem_limit = _vmem_budget_bytes()
    if tile_rows is None:
        tile_rows = _pick_tile_rows(N, D, dtype_bytes, budget_bytes)

    # TODO(synk): for D < 128 (or D not a multiple of 128) the lane axis is
    # mostly padding; folding k = 128//D rows into the lane dim with a
    # segmented lane reduction would recover bandwidth. Production D >= 1024
    # is lane-dense, so this fast path is not implemented here.

    kernel = functools.partial(_rmsnorm_kernel, eps=eps, use_var=use_var, d=D)

    grid = (pl.cdiv(N, tile_rows),)                    # partial last block masked

    cost = pl.CostEstimate(
        flops=4 * N * D,                               # sum, center, square-sum, scale
        transcendentals=N,                             # one rsqrt per row
        bytes_accessed=2 * N * D * dtype_bytes + D * 4,
    )

    out = pl.pallas_call(
        kernel,
        out_shape=jax.ShapeDtypeStruct((N, D), x.dtype),
        grid=grid,
        in_specs=[
            pl.BlockSpec((tile_rows, D), lambda i: (i, 0)),
            pl.BlockSpec((1, D), lambda i: (0, 0)),    # constant block, reused
        ],
        out_specs=pl.BlockSpec((tile_rows, D), lambda i: (i, 0)),
        compiler_params=pltpu.CompilerParams(
            dimension_semantics=("parallel",),         # rows independent; megacore OK
            vmem_limit_bytes=vmem_limit,
        ),
        cost_estimate=cost,
    )(x2, alpha2)

    return out.reshape(B, S, D)


def _rms_norm_ref(x, alpha, eps, use_var):
    # Pure-JAX reference mirroring the PyTorch _rms_norm (dtype=None).
    xf = x.astype(jnp.float32)
    if use_var:
        var = eps + jnp.var(xf, axis=2, keepdims=True, ddof=1)
    else:
        var = eps + jnp.mean(xf * xf, axis=2, keepdims=True)
    return (xf * (alpha.astype(jnp.float32) * lax.rsqrt(var))).astype(x.dtype)


if __name__ == "__main__":
    key = jax.random.PRNGKey(0)
    eps = 1e-5

    # Primary case: matches the module's forward (3D input, dim=D).
    B, S, D = 2, 8, 32
    x = jax.random.normal(key, (B, S, D), dtype=jnp.float32)
    alpha = jnp.full((1, 1, D), 1.0, dtype=jnp.float32)  # torch.full((1,1,dim), 1.0)

    out = rms_norm(x, alpha, eps=eps, use_var=True)
    out = jax.block_until_ready(out)
    ref = _rms_norm_ref(x, alpha, eps, True)
    assert out.shape == (B, S, D)
    assert out.dtype == x.dtype
    assert jnp.allclose(out, ref, atol=1e-5, rtol=1e-5)

    # use_var=False path (mean-square instead of unbiased variance).
    out2 = jax.block_until_ready(rms_norm(x, alpha, eps=eps, use_var=False))
    ref2 = _rms_norm_ref(x, alpha, eps, False)
    assert jnp.allclose(out2, ref2, atol=1e-5, rtol=1e-5)

    # Partial-block path: N = B*S not a multiple of the row tile — exercises
    # the masked final block (no pad/slice in the wrapper).
    B3, S3 = 3, 5
    x3 = jax.random.normal(jax.random.PRNGKey(1), (B3, S3, D), dtype=jnp.float32)
    out3 = jax.block_until_ready(
        rms_norm(x3, alpha, eps=eps, use_var=True, tile_rows=8))
    ref3 = _rms_norm_ref(x3, alpha, eps, True)
    assert jnp.allclose(out3, ref3, atol=1e-5, rtol=1e-5)

    print("KERNEL_OK")
</pallas_src>

<mosaic_0001>
module attributes {stable_mosaic.version = 11 : i64} {
  func.func @_rmsnorm_kernel(%arg0: i32, %arg1: memref<16x32xf32, #tpu.memory_space<vmem>>, %arg2: memref<1x32xf32, #tpu.memory_space<vmem>>, %arg3: memref<16x32xf32, #tpu.memory_space<vmem>>) attributes {dimension_semantics = [#tpu.dimension_semantics<parallel>], iteration_bounds = array<i64: 1>, scalar_prefetch = 0 : i64, scratch_operands = 0 : i64, tpu.core_type = #tpu.core_type<tc>, window_params = [{transform_indices = @transform_0, window_bounds = array<i64: 16, 32>}, {pipeline_mode = #tpu.pipeline_mode<synchronous>, transform_indices = @transform_1, window_bounds = array<i64: 1, 32>}, {transform_indices = @transform_2, window_bounds = array<i64: 16, 32>}]} {
    %c0 = arith.constant 0 : index
    %c0_0 = arith.constant 0 : index
    %0 = vector.load %arg1[%c0, %c0_0] : memref<16x32xf32, #tpu.memory_space<vmem>>, vector<16x32xf32>
    %cst = arith.constant dense<0.000000e+00> : vector<16xf32>
    %1 = vector.multi_reduction <add>, %0, %cst [1] : vector<16x32xf32> to vector<16xf32>
    %2 = vector.shape_cast %1 : vector<16xf32> to vector<16x1xf32>
    %cst_1 = arith.constant 3.125000e-02 : f32
    %3 = vector.broadcast %cst_1 : f32 to vector<16x1xf32>
    %4 = arith.mulf %2, %3 : vector<16x1xf32>
    %5 = vector.broadcast %4 : vector<16x1xf32> to vector<16x32xf32>
    %6 = arith.subf %0, %5 : vector<16x32xf32>
    %7 = arith.mulf %6, %6 : vector<16x32xf32>
    %cst_2 = arith.constant dense<0.000000e+00> : vector<16xf32>
    %8 = vector.multi_reduction <add>, %7, %cst_2 [1] : vector<16x32xf32> to vector<16xf32>
    %9 = vector.shape_cast %8 : vector<16xf32> to vector<16x1xf32>
    %cst_3 = arith.constant 0.0322580636 : f32
    %10 = vector.broadcast %cst_3 : f32 to vector<16x1xf32>
    %11 = arith.mulf %9, %10 : vector<16x1xf32>
    %cst_4 = arith.constant 9.99999974E-6 : f32
    %12 = vector.broadcast %cst_4 : f32 to vector<16x1xf32>
    %13 = arith.addf %12, %11 : vector<16x1xf32>
    %14 = math.rsqrt %13 : vector<16x1xf32>
    %c0_5 = arith.constant 0 : index
    %c0_6 = arith.constant 0 : index
    %15 = vector.load %arg1[%c0_5, %c0_6] : memref<16x32xf32, #tpu.memory_space<vmem>>, vector<16x32xf32>
    %16 = vector.broadcast %14 : vector<16x1xf32> to vector<16x32xf32>
    %17 = arith.mulf %15, %16 : vector<16x32xf32>
    %c0_7 = arith.constant 0 : index
    %c0_8 = arith.constant 0 : index
    %18 = vector.load %arg2[%c0_7, %c0_8] : memref<1x32xf32, #tpu.memory_space<vmem>>, vector<1x32xf32>
    %19 = vector.broadcast %18 : vector<1x32xf32> to vector<16x32xf32>
    %20 = arith.mulf %17, %19 : vector<16x32xf32>
    %c0_9 = arith.constant 0 : index
    %c0_10 = arith.constant 0 : index
    %21 = vector.load %arg3[%c0_9, %c0_10] : memref<16x32xf32, #tpu.memory_space<vmem>>, vector<16x32xf32>
    tpu.vector_store %arg3[%c0_9, %c0_10], %20 {strides = array<i32>} : memref<16x32xf32, #tpu.memory_space<vmem>>, vector<16x32xf32>,
    return
  }
  func.func @transform_0(%arg0: i32) -> (i32, i32) {
    %c0_i32 = arith.constant 0 : i32
    %c0_i32_0 = arith.constant 0 : i32
    return %arg0, %c0_i32 : i32, i32
  }
  func.func @transform_1(%arg0: i32) -> (i32, i32) {
    %c0_i32 = arith.constant 0 : i32
    %c0_i32_0 = arith.constant 0 : i32
    %c0_i32_1 = arith.constant 0 : i32
    return %c0_i32, %c0_i32_0 : i32, i32
  }
  func.func @transform_2(%arg0: i32) -> (i32, i32) {
    %c0_i32 = arith.constant 0 : i32
    %c0_i32_0 = arith.constant 0 : i32
    return %arg0, %c0_i32 : i32, i32
  }
}

</mosaic_0001>

<bundles_post_ra>
// kernel: tpu_custom_call.1
= control target key start
LH: loop header
LB: loop body
LE: loop exit
PB: predicated region body
PF: predicated region fallthrough
CT: control target
= control target key end

     0   :  { %7 = vsyncpa [#allocation3], 0  ;;  %s198_s0 = inlined_call_operand.hbm [shape: f32[16,32], index: 0, kind: input, shape index: {}]   ;;  %s199_s1 = inlined_call_operand.vmem [shape: f32[1,32], index: 1, kind: input, shape index: {}]   ;;  %s200_s2 = inlined_call_operand.hbm [shape: f32[16,32], index: 2, kind: output, shape index: {}]  }
   0x1   :  { %8 = vsyncpa [#allocation4], 0  ;;  %s140_s9 = smov [#allocation2]   ;;  %s92_s13 = scalar_lea.hbm %s198_s0, 256 }
   0x2   :  { %s14_s10 = sshll.u32 %s140_s9, 4  ;;  %p93_p0 = scmp.ne.s32.totalorder %s198_s0, %s92_s13  ;;  %s15_s10 = int_to_ptr.vmem [resolvable:$true] %s14_s10 }
   0x3   :  { %p96_p1 = scmp.lt.u32.totalorder %s92_s13, %s198_s0 }
   0x5   :  { %p98_p2 = pnand %p96_p1, %p93_p0 }
   0x7   :  { %101 = shalt.err (!%p98_p2)
}
   0x8   :  { %s102_s18 = scalar_lea.vmem %s15_s10, 256  ;;  %p107_p4 = scmp.lt.s32.totalorder %s15_s10, %s15_s10 }
   0x9   :  { %p103_p3 = scmp.ne.s32.totalorder %s15_s10, %s102_s18  ;;  %p108_p5 = scmp.lt.s32.totalorder %s102_s18, %s102_s18 }
   0xb   :  { %p109_p6 = por %p108_p5, %p107_p4 }
   0xd   :  { %p110_p7 = pnand %p109_p6, %p103_p3 }
   0xf   :  { %113 = shalt.err (!%p110_p7)
}
  0x10   :  { %s141_s19 = smov 128   ;;  %s142_s20 = smov 8  }
  0x11   :  { %20 = dma.hbm_to_vmem [thread:$0]  %s198_s0, 256, %s15_s10, [#allocation3], %s141_s19, %s141_s19, %s142_s20  }
  0x12   :  { %136 = dma.done.wait [#allocation3], 256  }
  0x13   :  { %137 = vsyncadd [#allocation3], 4294967040  ;;  %vm28_vm0 = vcmask 261120   ;;  %v26_v0 = vld [vmem:[#allocation2] sm:$0xff]  ;;  %v27_v1 = vld [vmem:[#allocation2 + $0x8] sm:$0xff]  ;;  %s143_s24 = smov [#allocation5]  }
  0x14   :  { %v29_v2 = vsel %vm28_vm0, %v26_v0, 0.0  ;;  %v32_v3 = vsel %vm28_vm0, %v27_v1, 0.0  ;;  %v83_v21 = vld [vmem:[%s199_s1] ss:$0 sm:$0xff]  ;;  %s71_s25 = sshll.u32 %s143_s24, 4  ;;  %s72_s25 = int_to_ptr.vmem [resolvable:$true] %s71_s25 }
  0x15   :  { %30 = vadd.xlane.f32.xlu0 %v29_v2  ;;  %s114_s26 = scalar_lea.vmem %s72_s25, 256  ;;  %p119_p9 = scmp.lt.s32.totalorder %s72_s25, %s72_s25 }
  0x16   :  { %p115_p8 = scmp.ne.s32.totalorder %s72_s25, %s114_s26  ;;  %p120_p10 = scmp.lt.s32.totalorder %s114_s26, %s114_s26 }
  0x18   :  { %p121_p11 = por %p120_p10, %p119_p9 }
  0x19   :  { %33 = vadd.xlane.f32.xlu0 %v32_v3 }
  0x1a   :  { %p122_p12 = pnand %p121_p11, %p115_p8 }
  0xa2   :  { %v31_v4 = vpop.xlane.xlu0 %30 }
  0xa3   :  { %v35_v5 = vmul.f32 0.03125, %v31_v4 }
  0xa5   :  { %v37_v6 = vsub.f32 %v26_v0, %v35_v5 }
  0xa6   :  { %v34_v7 = vpop.xlane.xlu0 %33 }
  0xa7   :  { %v36_v8 = vmul.f32 0.03125, %v34_v7  ;;  %v39_v9 = vmul.f32 %v37_v6, %v37_v6 }
  0xa9   :  { %v38_v10 = vsub.f32 %v27_v1, %v36_v8  ;;  %v41_v11 = vsel %vm28_vm0, %v39_v9, 0.0 }
  0xaa   :  { %42 = vadd.xlane.f32.xlu1 %v41_v11 }
  0xab   :  { %v40_v12 = vmul.f32 %v38_v10, %v38_v10 }
  0xad   :  { %v44_v13 = vsel %vm28_vm0, %v40_v12, 0.0 }
  0xae   :  { %45 = vadd.xlane.f32.xlu1 %v44_v13 }
 0x137   :  { %v43_v14 = vpop.xlane.xlu1 %42 }
 0x138   :  { %v47_v15 = vmul.f32 0.032258064, %v43_v14 }
 0x13a   :  { %v49_v16 = vadd.f32 1e-05, %v47_v15 }
 0x13b   :  { %v46_v17 = vpop.xlane.xlu1 %45 }
 0x13c   :  { %88 = vrsqrt.f32 %v49_v16  ;;  %v48_v18 = vmul.f32 0.032258064, %v46_v17 }
 0x13e   :  { %v50_v19 = vadd.f32 1e-05, %v48_v18 }
 0x140   :  { %90 = vrsqrt.f32 %v50_v19 }
 0x146   :  { %v89_v20 = vpop.eup %88 }
 0x147   :  { %v53_v22 = vmul.f32 %v89_v20, %v26_v0 }
 0x149   :  { %v62_v23 = vmul.f32 %v83_v21, %v53_v22 }
 0x14a   :  { %v91_v24 = vpop.eup %90 }
 0x14b   :  { %v54_v25 = vmul.f32 %v91_v24, %v27_v1  ;;  %64 = vst.msk [vmem:[#allocation5] sm:$0xff] %vm28_vm0, %v62_v23 }
 0x14d   :  { %v63_v26 = vmul.f32 %v83_v21, %v54_v25 }
 0x14f   :  { %65 = vst.msk [vmem:[#allocation5 + $0x8] sm:$0xff] %vm28_vm0, %v63_v26 }
 0x150   :  { %125 = shalt.err (!%p122_p12)
}
 0x151   :  { %s126_s28 = scalar_lea.hbm %s200_s2, 256 }
 0x152   :  { %p127_p13 = scmp.ne.s32.totalorder %s200_s2, %s126_s28  ;;  %p130_p0 = scmp.lt.u32.totalorder %s126_s28, %s200_s2 }
 0x154   :  { %p132_p1 = pnand %p130_p0, %p127_p13 }
 0x156   :  { %135 = shalt.err (!%p132_p1)
}
 0x157   :  { %77 = dma.vmem_to_hbm [thread:$0]  %s72_s25, 256, %s200_s2, [#allocation4], %s141_s19, %s141_s19, %s142_s20  }
 0x158   :  { %138 = dma.done.wait [#allocation4], 256  }
 0x159   :  { %139 = vsyncadd [#allocation4], 4294967040 }
 0x15a   :  { %81 = vsyncpa [#allocation3], 1 }
 0x15b   :  { %82 = vsyncpa [#allocation4], 1 }

</bundles_post_ra>
